<compile_context>
chip_gen: v7x
topology: tpu7x:2x2x1
jax: 0.10.0
libtpu: 0.0.40
codegen_flags: <defaults>
</compile_context>

<pallas_src>
from functools import partial

import jax
import jax.numpy as jnp
import numpy as np
from jax.experimental import pallas as pl
from jax.experimental.pallas import tpu as pltpu

EPS = 1e-5
MXU_DTYPE = jnp.bfloat16   # MXU operand dtype (f32 accumulation)


# --------------------------- host-side weight prep --------------------------
def _band_matrix(w_dy, win, wout, off):
    """Block-banded matrix expressing the width-direction 3-tap conv as a matmul.

    w_dy : (3, Ci, Co)  the three width taps of one kernel row dy.
    Returns M of shape (win*Ci, wout*Co) with
      M[u*Ci:(u+1)*Ci, x*Co:(x+1)*Co] = w_dy[u - x - off]  if 0 <= u-x-off < 3 else 0
    so that (rows of folded input) @ M == width-conv output (zero boundary handled
    by the band structure / input padding).
    """
    _, ci, co = w_dy.shape
    u = jnp.arange(win)[:, None]
    x = jnp.arange(wout)[None, :]
    d = u - x - off                                        # tap index per (u, x)
    valid = (d >= 0) & (d < 3)
    blocks = jnp.where(valid[:, :, None, None], w_dy[jnp.clip(d, 0, 2)], 0.0)
    return blocks.transpose(0, 2, 1, 3).reshape(win * ci, wout * co)


# --------------------------------- kernel -----------------------------------
def conv_block_kernel(xp_ref, wb1_ref, wb2_ref, g1_ref, be1_ref, g2_ref, be2_ref,
                      fold_ref, unfold_ref, out_ref, h1pad_ref, *, H, W, Cout):
    # xp_ref    : (N, H+2, (W+2)*Cin)  bf16, zero-padded, (W,C) folded into lanes
    # wb1_ref   : (3, (W+2)*Cin, W*Cout) bf16 banded conv1 weights (one per dy)
    # wb2_ref   : (3, W*Cout,     W*Cout) bf16 banded conv2 weights (one per dy)
    # g/be refs : (1, Cout) f32 BN affine params
    # fold_ref  : (W*Cout, Cout) f32  per-lane -> per-channel reduction matrix
    # unfold_ref: (Cout, W*Cout) f32  per-channel -> per-lane broadcast matrix
    # out_ref   : (N*H, W*Cout) f32   lane-dense output
    # h1pad_ref : (N, H+2, W*Cout) bf16 scratch (lane-dense, 1-row H halo)
    N = xp_ref.shape[0]
    NH = N * H
    WC = W * Cout
    count = float(N * H * W)

    fold = fold_ref[...]
    unfold = unfold_ref[...]

    def conv_rows(src_ref, wb_ref):
        # 3x3 conv = 3 row-shifted (N*H, K) @ (K, W*Cout) MXU matmuls.
        acc = None
        for dy in range(3):
            a = src_ref[:, dy:dy + H, :].reshape(NH, src_ref.shape[-1])
            t = jnp.dot(a, wb_ref[dy], preferred_element_type=jnp.float32)
            acc = t if acc is None else acc + t            # init from first tap
        return acc                                          # (NH, WC) f32

    def bn_relu(y, gamma, beta):
        # Train-mode BatchNorm over (N,H,W) per channel, single sweep:
        # per-lane sum / sum-of-squares -> per-channel via fold matmul,
        # then one fused scale+shift FMA + ReLU (lane-dense).
        s = jnp.sum(y, axis=0, keepdims=True)                               # (1, WC)
        ss = jnp.sum(y * y, axis=0, keepdims=True)                          # (1, WC)
        s_c = jnp.dot(s, fold, preferred_element_type=jnp.float32)          # (1, C)
        ss_c = jnp.dot(ss, fold, preferred_element_type=jnp.float32)        # (1, C)
        mean = s_c / count
        var = ss_c / count - mean * mean                                    # biased var
        scale_c = gamma * jax.lax.rsqrt(var + EPS)
        shift_c = beta - mean * scale_c
        scale = jnp.dot(scale_c, unfold, preferred_element_type=jnp.float32)  # (1, WC)
        shift = jnp.dot(shift_c, unfold, preferred_element_type=jnp.float32)  # (1, WC)
        return jnp.maximum(y * scale + shift, 0.0)

    # ---- conv1 -> bn1 -> relu (conv bias omitted: no-op before batch-stat BN) ----
    y1 = conv_rows(xp_ref, wb1_ref)
    h1 = bn_relu(y1, g1_ref[...], be1_ref[...])                             # (NH, WC)

    # Stage h1 lane-dense in bf16 with a 1-row zero halo along H (W halo of conv2
    # is handled inside the banded weight matrix, so no W padding needed).
    h1pad_ref[:, 0:1, :] = jnp.zeros((N, 1, WC), MXU_DTYPE)
    h1pad_ref[:, H + 1:H + 2, :] = jnp.zeros((N, 1, WC), MXU_DTYPE)
    h1pad_ref[:, 1:H + 1, :] = h1.astype(MXU_DTYPE).reshape(N, H, WC)

    # ---- conv2 -> bn2 -> relu ----
    y2 = conv_rows(h1pad_ref, wb2_ref)
    h2 = bn_relu(y2, g2_ref[...], be2_ref[...])

    out_ref[...] = h2                                                        # full-width store


# --------------------------------- wrapper ----------------------------------
def conv_block_pallas(x_nchw, params):
    """Forward pass of ConvBlock. x_nchw: (N, Cin, H, W) float32."""
    x = jnp.transpose(x_nchw, (0, 2, 3, 1)).astype(jnp.float32)   # NHWC
    N, H, W, Cin = x.shape
    Cout = params["w1"].shape[-1]
    WC = W * Cout

    # Pad H and W by 1, fold (W, C) into the lane axis, cast MXU operands to bf16.
    xp = jnp.pad(x, ((0, 0), (1, 1), (1, 1), (0, 0)))
    xp = xp.reshape(N, H + 2, (W + 2) * Cin).astype(MXU_DTYPE)

    # One-time weight transform: HWIO -> block-banded matmul weights per dy tap.
    w1 = params["w1"].astype(jnp.float32)
    w2 = params["w2"].astype(jnp.float32)
    wb1 = jnp.stack([_band_matrix(w1[dy], W + 2, W, off=0) for dy in range(3)]
                    ).astype(MXU_DTYPE)                    # (3, (W+2)*Cin, W*Cout)
    wb2 = jnp.stack([_band_matrix(w2[dy], W, W, off=-1) for dy in range(3)]
                    ).astype(MXU_DTYPE)                    # (3, W*Cout,     W*Cout)

    # Per-lane <-> per-channel fold / broadcast matrices for BN statistics.
    fold = jnp.tile(jnp.eye(Cout, dtype=jnp.float32), (W, 1))   # (W*Cout, Cout)
    unfold = fold.T                                             # (Cout, W*Cout)

    row = lambda v: v.reshape(1, -1).astype(jnp.float32)
    # NOTE: conv biases b1/b2 are intentionally NOT passed to the kernel; a
    # per-channel bias before train-mode BatchNorm cancels exactly.

    vmem = pl.BlockSpec(memory_space=pltpu.MemorySpace.VMEM)
    kernel = partial(conv_block_kernel, H=H, W=W, Cout=Cout)
    out2d = pl.pallas_call(
        kernel,
        out_shape=jax.ShapeDtypeStruct((N * H, WC), jnp.float32),
        in_specs=[vmem] * 9,
        out_specs=vmem,
        scratch_shapes=[pltpu.VMEM((N, H + 2, WC), MXU_DTYPE)],
    )(xp, wb1, wb2, row(params["g1"]), row(params["be1"]),
      row(params["g2"]), row(params["be2"]), fold, unfold)

    out = out2d.reshape(N, H, W, Cout)
    return jnp.transpose(out, (0, 3, 1, 2))                 # back to NCHW


# ----------------------- pure-JAX reference (for checking) ------------------
def conv_block_ref(x_nchw, params):
    x = jnp.transpose(x_nchw, (0, 2, 3, 1)).astype(jnp.float32)  # NHWC

    def conv(h, w, b):
        y = jax.lax.conv_general_dilated(
            h, w, window_strides=(1, 1), padding="SAME",
            dimension_numbers=("NHWC", "HWIO", "NHWC"))
        return y + b.reshape(1, 1, 1, -1)          # bias kept here on purpose

    def bn_relu(y, g, be):
        mean = jnp.mean(y, axis=(0, 1, 2), keepdims=True)
        var = jnp.mean((y - mean) ** 2, axis=(0, 1, 2), keepdims=True)
        yn = (y - mean) * jax.lax.rsqrt(var + EPS)
        return jnp.maximum(yn * g.reshape(1, 1, 1, -1) + be.reshape(1, 1, 1, -1), 0.0)

    h = bn_relu(conv(x, params["w1"], params["b1"]), params["g1"], params["be1"])
    h = bn_relu(conv(h, params["w2"], params["b2"]), params["g2"], params["be2"])
    return jnp.transpose(h, (0, 3, 1, 2))


def init_params(key, in_channels, out_channels):
    ks = jax.random.split(key, 8)
    return {
        "w1": 0.1 * jax.random.normal(ks[0], (3, 3, in_channels, out_channels), jnp.float32),
        "b1": 0.1 * jax.random.normal(ks[1], (out_channels,), jnp.float32),
        "g1": 1.0 + 0.1 * jax.random.normal(ks[2], (out_channels,), jnp.float32),
        "be1": 0.1 * jax.random.normal(ks[3], (out_channels,), jnp.float32),
        "w2": 0.1 * jax.random.normal(ks[4], (3, 3, out_channels, out_channels), jnp.float32),
        "b2": 0.1 * jax.random.normal(ks[5], (out_channels,), jnp.float32),
        "g2": 1.0 + 0.1 * jax.random.normal(ks[6], (out_channels,), jnp.float32),
        "be2": 0.1 * jax.random.normal(ks[7], (out_channels,), jnp.float32),
    }


if __name__ == "__main__":
    key = jax.random.PRNGKey(0)
    k_x, k_p = jax.random.split(key)

    N, Cin, Cout, H, W = 2, 4, 8, 16, 16
    x = jax.random.normal(k_x, (N, Cin, H, W), jnp.float32)
    params = init_params(k_p, Cin, Cout)

    out = jax.block_until_ready(conv_block_pallas(x, params))
    ref = jax.block_until_ready(conv_block_ref(x, params))

    np.testing.assert_allclose(np.asarray(out), np.asarray(ref),
                               rtol=2e-2, atol=2e-2)
    assert out.shape == (N, Cout, H, W)
    print("KERNEL_OK")
</pallas_src>

<mosaic_0001>
module attributes {stable_mosaic.version = 11 : i64} {
  func.func @conv_block_kernel(%arg0: memref<2x18x72xbf16, #tpu.memory_space<vmem>>, %arg1: memref<3x72x128xbf16, #tpu.memory_space<vmem>>, %arg2: memref<3x128x128xbf16, #tpu.memory_space<vmem>>, %arg3: memref<1x8xf32, #tpu.memory_space<vmem>>, %arg4: memref<1x8xf32, #tpu.memory_space<vmem>>, %arg5: memref<1x8xf32, #tpu.memory_space<vmem>>, %arg6: memref<1x8xf32, #tpu.memory_space<vmem>>, %arg7: memref<128x8xf32, #tpu.memory_space<vmem>>, %arg8: memref<8x128xf32, #tpu.memory_space<vmem>>, %arg9: memref<32x128xf32, #tpu.memory_space<vmem>>, %arg10: memref<2x18x128xbf16, #tpu.memory_space<vmem>>) attributes {dimension_semantics = [], scalar_prefetch = 0 : i64, scratch_operands = 1 : i64, tpu.core_type = #tpu.core_type<tc>} {
    %c0 = arith.constant 0 : index
    %c0_0 = arith.constant 0 : index
    %0 = vector.load %arg7[%c0, %c0_0] : memref<128x8xf32, #tpu.memory_space<vmem>>, vector<128x8xf32>
    %c0_1 = arith.constant 0 : index
    %c0_2 = arith.constant 0 : index
    %1 = vector.load %arg8[%c0_1, %c0_2] : memref<8x128xf32, #tpu.memory_space<vmem>>, vector<8x128xf32>
    %c0_3 = arith.constant 0 : index
    %c0_4 = arith.constant 0 : index
    %c0_5 = arith.constant 0 : index
    %2 = vector.load %arg0[%c0_3, %c0_4, %c0_5] : memref<2x18x72xbf16, #tpu.memory_space<vmem>>, vector<2x16x72xbf16>
    %3 = vector.shape_cast %2 : vector<2x16x72xbf16> to vector<32x72xbf16>
    %c0_6 = arith.constant 0 : index
    %c0_7 = arith.constant 0 : index
    %c0_8 = arith.constant 0 : index
    %4 = vector.load %arg1[%c0_6, %c0_7, %c0_8] : memref<3x72x128xbf16, #tpu.memory_space<vmem>>, vector<1x72x128xbf16>
    %5 = vector.shape_cast %4 : vector<1x72x128xbf16> to vector<72x128xbf16>
    %cst = arith.constant dense<0.000000e+00> : vector<32x128xf32>
    %6 = tpu.matmul %3, %5, %cst {dimension_numbers = #tpu.dot_dimension_numbers<[1], [0], [0], [1], [0, 0, 1, 1], [], []>} : vector<32x72xbf16>, vector<72x128xbf16>, vector<32x128xf32> -> vector<32x128xf32>
    %c0_9 = arith.constant 0 : index
    %c1 = arith.constant 1 : index
    %c0_10 = arith.constant 0 : index
    %7 = vector.load %arg0[%c0_9, %c1, %c0_10] : memref<2x18x72xbf16, #tpu.memory_space<vmem>>, vector<2x16x72xbf16>
    %8 = vector.shape_cast %7 : vector<2x16x72xbf16> to vector<32x72xbf16>
    %c1_11 = arith.constant 1 : index
    %c0_12 = arith.constant 0 : index
    %c0_13 = arith.constant 0 : index
    %9 = vector.load %arg1[%c1_11, %c0_12, %c0_13] : memref<3x72x128xbf16, #tpu.memory_space<vmem>>, vector<1x72x128xbf16>
    %10 = vector.shape_cast %9 : vector<1x72x128xbf16> to vector<72x128xbf16>
    %cst_14 = arith.constant dense<0.000000e+00> : vector<32x128xf32>
    %11 = tpu.matmul %8, %10, %cst_14 {dimension_numbers = #tpu.dot_dimension_numbers<[1], [0], [0], [1], [0, 0, 1, 1], [], []>} : vector<32x72xbf16>, vector<72x128xbf16>, vector<32x128xf32> -> vector<32x128xf32>
    %12 = arith.addf %6, %11 : vector<32x128xf32>
    %c0_15 = arith.constant 0 : index
    %c2 = arith.constant 2 : index
    %c0_16 = arith.constant 0 : index
    %13 = vector.load %arg0[%c0_15, %c2, %c0_16] : memref<2x18x72xbf16, #tpu.memory_space<vmem>>, vector<2x16x72xbf16>
    %14 = vector.shape_cast %13 : vector<2x16x72xbf16> to vector<32x72xbf16>
    %c2_17 = arith.constant 2 : index
    %c0_18 = arith.constant 0 : index
    %c0_19 = arith.constant 0 : index
    %15 = vector.load %arg1[%c2_17, %c0_18, %c0_19] : memref<3x72x128xbf16, #tpu.memory_space<vmem>>, vector<1x72x128xbf16>
    %16 = vector.shape_cast %15 : vector<1x72x128xbf16> to vector<72x128xbf16>
    %cst_20 = arith.constant dense<0.000000e+00> : vector<32x128xf32>
    %17 = tpu.matmul %14, %16, %cst_20 {dimension_numbers = #tpu.dot_dimension_numbers<[1], [0], [0], [1], [0, 0, 1, 1], [], []>} : vector<32x72xbf16>, vector<72x128xbf16>, vector<32x128xf32> -> vector<32x128xf32>
    %18 = arith.addf %12, %17 : vector<32x128xf32>
    %c0_21 = arith.constant 0 : index
    %c0_22 = arith.constant 0 : index
    %19 = vector.load %arg3[%c0_21, %c0_22] : memref<1x8xf32, #tpu.memory_space<vmem>>, vector<1x8xf32>
    %c0_23 = arith.constant 0 : index
    %c0_24 = arith.constant 0 : index
    %20 = vector.load %arg4[%c0_23, %c0_24] : memref<1x8xf32, #tpu.memory_space<vmem>>, vector<1x8xf32>
    %cst_25 = arith.constant dense<0.000000e+00> : vector<128xf32>
    %21 = vector.multi_reduction <add>, %18, %cst_25 [0] : vector<32x128xf32> to vector<128xf32>
    %22 = vector.shape_cast %21 : vector<128xf32> to vector<1x128xf32>
    %23 = arith.mulf %18, %18 : vector<32x128xf32>
    %cst_26 = arith.constant dense<0.000000e+00> : vector<128xf32>
    %24 = vector.multi_reduction <add>, %23, %cst_26 [0] : vector<32x128xf32> to vector<128xf32>
    %25 = vector.shape_cast %24 : vector<128xf32> to vector<1x128xf32>
    %cst_27 = arith.constant dense<0.000000e+00> : vector<1x8xf32>
    %26 = tpu.matmul %22, %0, %cst_27 {dimension_numbers = #tpu.dot_dimension_numbers<[1], [0], [0], [1], [0, 0, 1, 1], [], []>} : vector<1x128xf32>, vector<128x8xf32>, vector<1x8xf32> -> vector<1x8xf32>
    %cst_28 = arith.constant dense<0.000000e+00> : vector<1x8xf32>
    %27 = tpu.matmul %25, %0, %cst_28 {dimension_numbers = #tpu.dot_dimension_numbers<[1], [0], [0], [1], [0, 0, 1, 1], [], []>} : vector<1x128xf32>, vector<128x8xf32>, vector<1x8xf32> -> vector<1x8xf32>
    %cst_29 = arith.constant 5.120000e+02 : f32
    %28 = vector.broadcast %cst_29 : f32 to vector<1x8xf32>
    %29 = arith.divf %26, %28 : vector<1x8xf32>
    %cst_30 = arith.constant 5.120000e+02 : f32
    %30 = vector.broadcast %cst_30 : f32 to vector<1x8xf32>
    %31 = arith.divf %27, %30 : vector<1x8xf32>
    %32 = arith.mulf %29, %29 : vector<1x8xf32>
    %33 = arith.subf %31, %32 : vector<1x8xf32>
    %cst_31 = arith.constant 9.99999974E-6 : f32
    %34 = vector.broadcast %cst_31 : f32 to vector<1x8xf32>
    %35 = arith.addf %33, %34 : vector<1x8xf32>
    %36 = math.rsqrt %35 : vector<1x8xf32>
    %37 = arith.mulf %19, %36 : vector<1x8xf32>
    %38 = arith.mulf %29, %37 : vector<1x8xf32>
    %39 = arith.subf %20, %38 : vector<1x8xf32>
    %cst_32 = arith.constant dense<0.000000e+00> : vector<1x128xf32>
    %40 = tpu.matmul %37, %1, %cst_32 {dimension_numbers = #tpu.dot_dimension_numbers<[1], [0], [0], [1], [0, 0, 1, 1], [], []>} : vector<1x8xf32>, vector<8x128xf32>, vector<1x128xf32> -> vector<1x128xf32>
    %cst_33 = arith.constant dense<0.000000e+00> : vector<1x128xf32>
    %41 = tpu.matmul %39, %1, %cst_33 {dimension_numbers = #tpu.dot_dimension_numbers<[1], [0], [0], [1], [0, 0, 1, 1], [], []>} : vector<1x8xf32>, vector<8x128xf32>, vector<1x128xf32> -> vector<1x128xf32>
    %42 = vector.broadcast %40 : vector<1x128xf32> to vector<32x128xf32>
    %43 = arith.mulf %18, %42 : vector<32x128xf32>
    %44 = vector.broadcast %41 : vector<1x128xf32> to vector<32x128xf32>
    %45 = arith.addf %43, %44 : vector<32x128xf32>
    %cst_34 = arith.constant 0.000000e+00 : f32
    %46 = vector.broadcast %cst_34 : f32 to vector<32x128xf32>
    %47 = arith.maximumf %45, %46 : vector<32x128xf32>
    %cst_35 = arith.constant 0.000000e+00 : bf16
    %48 = vector.broadcast %cst_35 : bf16 to vector<2x1x128xbf16>
    %c0_36 = arith.constant 0 : index
    %c0_37 = arith.constant 0 : index
    %c0_38 = arith.constant 0 : index
    %49 = vector.load %arg10[%c0_36, %c0_37, %c0_38] : memref<2x18x128xbf16, #tpu.memory_space<vmem>>, vector<2x1x128xbf16>
    tpu.vector_store %arg10[%c0_36, %c0_37, %c0_38], %48 {strides = array<i32>} : memref<2x18x128xbf16, #tpu.memory_space<vmem>>, vector<2x1x128xbf16>,
    %cst_39 = arith.constant 0.000000e+00 : bf16
    %50 = vector.broadcast %cst_39 : bf16 to vector<2x1x128xbf16>
    %c0_40 = arith.constant 0 : index
    %c17 = arith.constant 17 : index
    %c0_41 = arith.constant 0 : index
    %51 = vector.load %arg10[%c0_40, %c17, %c0_41] : memref<2x18x128xbf16, #tpu.memory_space<vmem>>, vector<2x1x128xbf16>
    tpu.vector_store %arg10[%c0_40, %c17, %c0_41], %50 {strides = array<i32>} : memref<2x18x128xbf16, #tpu.memory_space<vmem>>, vector<2x1x128xbf16>,
    %52 = arith.truncf %47 : vector<32x128xf32> to vector<32x128xbf16>
    %53 = vector.shape_cast %52 : vector<32x128xbf16> to vector<2x16x128xbf16>
    %c0_42 = arith.constant 0 : index
    %c1_43 = arith.constant 1 : index
    %c0_44 = arith.constant 0 : index
    %54 = vector.load %arg10[%c0_42, %c1_43, %c0_44] : memref<2x18x128xbf16, #tpu.memory_space<vmem>>, vector<2x16x128xbf16>
    tpu.vector_store %arg10[%c0_42, %c1_43, %c0_44], %53 {strides = array<i32>} : memref<2x18x128xbf16, #tpu.memory_space<vmem>>, vector<2x16x128xbf16>,
    %c0_45 = arith.constant 0 : index
    %c0_46 = arith.constant 0 : index
    %c0_47 = arith.constant 0 : index
    %55 = vector.load %arg10[%c0_45, %c0_46, %c0_47] : memref<2x18x128xbf16, #tpu.memory_space<vmem>>, vector<2x16x128xbf16>
    %56 = vector.shape_cast %55 : vector<2x16x128xbf16> to vector<32x128xbf16>
    %c0_48 = arith.constant 0 : index
    %c0_49 = arith.constant 0 : index
    %c0_50 = arith.constant 0 : index
    %57 = vector.load %arg2[%c0_48, %c0_49, %c0_50] : memref<3x128x128xbf16, #tpu.memory_space<vmem>>, vector<1x128x128xbf16>
    %58 = vector.shape_cast %57 : vector<1x128x128xbf16> to vector<128x128xbf16>
    %cst_51 = arith.constant dense<0.000000e+00> : vector<32x128xf32>
    %59 = tpu.matmul %56, %58, %cst_51 {dimension_numbers = #tpu.dot_dimension_numbers<[1], [0], [0], [1], [0, 0, 1, 1], [], []>} : vector<32x128xbf16>, vector<128x128xbf16>, vector<32x128xf32> -> vector<32x128xf32>
    %c0_52 = arith.constant 0 : index
    %c1_53 = arith.constant 1 : index
    %c0_54 = arith.constant 0 : index
    %60 = vector.load %arg10[%c0_52, %c1_53, %c0_54] : memref<2x18x128xbf16, #tpu.memory_space<vmem>>, vector<2x16x128xbf16>
    %61 = vector.shape_cast %60 : vector<2x16x128xbf16> to vector<32x128xbf16>
    %c1_55 = arith.constant 1 : index
    %c0_56 = arith.constant 0 : index
    %c0_57 = arith.constant 0 : index
    %62 = vector.load %arg2[%c1_55, %c0_56, %c0_57] : memref<3x128x128xbf16, #tpu.memory_space<vmem>>, vector<1x128x128xbf16>
    %63 = vector.shape_cast %62 : vector<1x128x128xbf16> to vector<128x128xbf16>
    %cst_58 = arith.constant dense<0.000000e+00> : vector<32x128xf32>
    %64 = tpu.matmul %61, %63, %cst_58 {dimension_numbers = #tpu.dot_dimension_numbers<[1], [0], [0], [1], [0, 0, 1, 1], [], []>} : vector<32x128xbf16>, vector<128x128xbf16>, vector<32x128xf32> -> vector<32x128xf32>
    %65 = arith.addf %59, %64 : vector<32x128xf32>
    %c0_59 = arith.constant 0 : index
    %c2_60 = arith.constant 2 : index
    %c0_61 = arith.constant 0 : index
    %66 = vector.load %arg10[%c0_59, %c2_60, %c0_61] : memref<2x18x128xbf16, #tpu.memory_space<vmem>>, vector<2x16x128xbf16>
    %67 = vector.shape_cast %66 : vector<2x16x128xbf16> to vector<32x128xbf16>
    %c2_62 = arith.constant 2 : index
    %c0_63 = arith.constant 0 : index
    %c0_64 = arith.constant 0 : index
    %68 = vector.load %arg2[%c2_62, %c0_63, %c0_64] : memref<3x128x128xbf16, #tpu.memory_space<vmem>>, vector<1x128x128xbf16>
    %69 = vector.shape_cast %68 : vector<1x128x128xbf16> to vector<128x128xbf16>
    %cst_65 = arith.constant dense<0.000000e+00> : vector<32x128xf32>
    %70 = tpu.matmul %67, %69, %cst_65 {dimension_numbers = #tpu.dot_dimension_numbers<[1], [0], [0], [1], [0, 0, 1, 1], [], []>} : vector<32x128xbf16>, vector<128x128xbf16>, vector<32x128xf32> -> vector<32x128xf32>
    %71 = arith.addf %65, %70 : vector<32x128xf32>
    %c0_66 = arith.constant 0 : index
    %c0_67 = arith.constant 0 : index
    %72 = vector.load %arg5[%c0_66, %c0_67] : memref<1x8xf32, #tpu.memory_space<vmem>>, vector<1x8xf32>
    %c0_68 = arith.constant 0 : index
    %c0_69 = arith.constant 0 : index
    %73 = vector.load %arg6[%c0_68, %c0_69] : memref<1x8xf32, #tpu.memory_space<vmem>>, vector<1x8xf32>
    %cst_70 = arith.constant dense<0.000000e+00> : vector<128xf32>
    %74 = vector.multi_reduction <add>, %71, %cst_70 [0] : vector<32x128xf32> to vector<128xf32>
    %75 = vector.shape_cast %74 : vector<128xf32> to vector<1x128xf32>
    %76 = arith.mulf %71, %71 : vector<32x128xf32>
    %cst_71 = arith.constant dense<0.000000e+00> : vector<128xf32>
    %77 = vector.multi_reduction <add>, %76, %cst_71 [0] : vector<32x128xf32> to vector<128xf32>
    %78 = vector.shape_cast %77 : vector<128xf32> to vector<1x128xf32>
    %cst_72 = arith.constant dense<0.000000e+00> : vector<1x8xf32>
    %79 = tpu.matmul %75, %0, %cst_72 {dimension_numbers = #tpu.dot_dimension_numbers<[1], [0], [0], [1], [0, 0, 1, 1], [], []>} : vector<1x128xf32>, vector<128x8xf32>, vector<1x8xf32> -> vector<1x8xf32>
    %cst_73 = arith.constant dense<0.000000e+00> : vector<1x8xf32>
    %80 = tpu.matmul %78, %0, %cst_73 {dimension_numbers = #tpu.dot_dimension_numbers<[1], [0], [0], [1], [0, 0, 1, 1], [], []>} : vector<1x128xf32>, vector<128x8xf32>, vector<1x8xf32> -> vector<1x8xf32>
    %cst_74 = arith.constant 5.120000e+02 : f32
    %81 = vector.broadcast %cst_74 : f32 to vector<1x8xf32>
    %82 = arith.divf %79, %81 : vector<1x8xf32>
    %cst_75 = arith.constant 5.120000e+02 : f32
    %83 = vector.broadcast %cst_75 : f32 to vector<1x8xf32>
    %84 = arith.divf %80, %83 : vector<1x8xf32>
    %85 = arith.mulf %82, %82 : vector<1x8xf32>
    %86 = arith.subf %84, %85 : vector<1x8xf32>
    %cst_76 = arith.constant 9.99999974E-6 : f32
    %87 = vector.broadcast %cst_76 : f32 to vector<1x8xf32>
    %88 = arith.addf %86, %87 : vector<1x8xf32>
    %89 = math.rsqrt %88 : vector<1x8xf32>
    %90 = arith.mulf %72, %89 : vector<1x8xf32>
    %91 = arith.mulf %82, %90 : vector<1x8xf32>
    %92 = arith.subf %73, %91 : vector<1x8xf32>
    %cst_77 = arith.constant dense<0.000000e+00> : vector<1x128xf32>
    %93 = tpu.matmul %90, %1, %cst_77 {dimension_numbers = #tpu.dot_dimension_numbers<[1], [0], [0], [1], [0, 0, 1, 1], [], []>} : vector<1x8xf32>, vector<8x128xf32>, vector<1x128xf32> -> vector<1x128xf32>
    %cst_78 = arith.constant dense<0.000000e+00> : vector<1x128xf32>
    %94 = tpu.matmul %92, %1, %cst_78 {dimension_numbers = #tpu.dot_dimension_numbers<[1], [0], [0], [1], [0, 0, 1, 1], [], []>} : vector<1x8xf32>, vector<8x128xf32>, vector<1x128xf32> -> vector<1x128xf32>
    %95 = vector.broadcast %93 : vector<1x128xf32> to vector<32x128xf32>
    %96 = arith.mulf %71, %95 : vector<32x128xf32>
    %97 = vector.broadcast %94 : vector<1x128xf32> to vector<32x128xf32>
    %98 = arith.addf %96, %97 : vector<32x128xf32>
    %cst_79 = arith.constant 0.000000e+00 : f32
    %99 = vector.broadcast %cst_79 : f32 to vector<32x128xf32>
    %100 = arith.maximumf %98, %99 : vector<32x128xf32>
    %c0_80 = arith.constant 0 : index
    %c0_81 = arith.constant 0 : index
    %101 = vector.load %arg9[%c0_80, %c0_81] : memref<32x128xf32, #tpu.memory_space<vmem>>, vector<32x128xf32>
    tpu.vector_store %arg9[%c0_80, %c0_81], %100 {strides = array<i32>} : memref<32x128xf32, #tpu.memory_space<vmem>>, vector<32x128xf32>,
    return
  }
}

</mosaic_0001>

<bundles_post_ra>
// kernel: tpu_custom_call.1
= control target key start
LH: loop header
LB: loop body
LE: loop exit
PB: predicated region body
PF: predicated region fallthrough
CT: control target
= control target key end

     0   :  { %14 = vsyncpa [#allocation4], 0  ;;  %s2914_s0 = inlined_call_operand.vmem [shape: bf16[2,18,72], index: 0, kind: input, shape index: {}]   ;;  %s2915_s1 = inlined_call_operand.vmem [shape: bf16[3,72,128], index: 1, kind: input, shape index: {}]   ;;  %s2916_s2 = inlined_call_operand.hbm [shape: bf16[3,128,128], index: 2, kind: input, shape index: {}]   ;;  %s2917_s3 = inlined_call_operand.vmem [shape: f32[1,8], index: 3, kind: input, shape index: {}]   ;;  %s2918_s4 = inlined_call_operand.vmem [shape: f32[1,8], index: 4, kind: input, shape index: {}]   ;;  %s2919_s5 = inlined_call_operand.vmem [shape: f32[1,8], index: 5, kind: input, shape index: {}]   ;;  %s2920_s6 = inlined_call_operand.vmem [shape: f32[1,8], index: 6, kind: input, shape index: {}]   ;;  %s2921_s7 = inlined_call_operand.vmem [shape: f32[128,8], index: 7, kind: input, shape index: {}]   ;;  %s2922_s8 = inlined_call_operand.vmem [shape: f32[8,128], index: 8, kind: input, shape index: {}]   ;;  %s2923_s9 = inlined_call_operand.hbm [shape: f32[32,128], index: 9, kind: output, shape index: {}]  }
   0x1   :  { %15 = vsyncpa [#allocation5], 0  ;;  %s2391_s30 = smov [#allocation3]   ;;  %s2343_s13 = scalar_lea.hbm %s2916_s2, 3072 }
   0x2   :  { %s25_s10 = sshll.u32 %s2391_s30, 4  ;;  %p2344_p0 = scmp.ne.s32.totalorder %s2916_s2, %s2343_s13  ;;  %s26_s10 = int_to_ptr.vmem [resolvable:$true] %s25_s10 }
   0x3   :  { %p2347_p1 = scmp.lt.u32.totalorder %s2343_s13, %s2916_s2 }
   0x5   :  { %p2349_p2 = pnand %p2347_p1, %p2344_p0 }
   0x7   :  { %2352 = shalt.err (!%p2349_p2)
}
   0x8   :  { %s2353_s18 = scalar_lea.vmem %s26_s10, 3072  ;;  %p2358_p4 = scmp.lt.s32.totalorder %s26_s10, %s26_s10 }
   0x9   :  { %p2354_p3 = scmp.ne.s32.totalorder %s26_s10, %s2353_s18  ;;  %p2359_p5 = scmp.lt.s32.totalorder %s2353_s18, %s2353_s18 }
   0xb   :  { %p2360_p6 = por %p2359_p5, %p2358_p4 }
   0xd   :  { %p2361_p7 = pnand %p2360_p6, %p2354_p3 }
   0xf   :  { %2364 = shalt.err (!%p2361_p7)
}
  0x10   :  { %s2392_s19 = smov 64   ;;  %s2393_s20 = smov 4  }
  0x11   :  { %31 = dma.hbm_to_vmem [thread:$0]  %s2916_s2, 3072, %s26_s10, [#allocation4], %s2392_s19, %s2392_s19, %s2393_s20  }
  0x12   :  { %2387 = dma.done.wait [#allocation4], 3072  }
  0x13   :  { %2388 = vsyncadd [#allocation4], 4294964224  ;;  %v2296_v0 = vld [vmem:[%s2915_s1] sm:$0xff]   ;;  %v2297_v1 = vld [vmem:[%s2915_s1 + $0x8] sm:$0xff]   ;;  %vm181_vm0 = vcmask 1043456   ;;  %vm174_vm1 = vcmask 588800  }
  0x14   :  { %1924 = vmatprep.subr.bf16.mxu0 %v2296_v0  ;;  %v2298_v2 = vld [vmem:[%s2915_s1 + $0x10] sm:$0xff]   ;;  %v2300_v3 = vld [vmem:[%s2915_s1 + $0x20] ss:$0 sps:$4 sm:$0xff]   ;;  %v2301_v4 = vld [vmem:[%s2915_s1 + $0x24] sm:$0xff]   ;;  %vm80_vm2 = vsmask.f32 3328 }
  0x15   :  { %1925 = vmatpush3.bf16.msra.mxu0 %v2296_v0  ;;  %v65_v5 = vld [vmem:[%s2914_s0] sm:$0xf]  ;;  %v2483_v6 = vld [vmem:[%s2914_s0 + $0x4] sm:$0xf]  ;;  %vm81_vm3 = vsmask.f32 7440  ;;  %1910 = vmatprep.subr.bf16.mxu1 %v2301_v4 }
  0x16   :  { %1926 = vmatprep.subr.bf16.mxu0 %v2297_v1  ;;  %v84_v7 = vshrl.u32 %v65_v5, 16  ;;  %v87_v8 = vshll.u32 %v65_v5, 16  ;;  %v2299_v9 = vld [vmem:[%s2915_s1 + $0x18] sm:$0xff]   ;;  %v1710_v10 = vcombine.low %v65_v5, %v2483_v6  ;;  %v340_v11 = vrot.slane %v2483_v6, 5  ;;  %1911 = vmatpush3.bf16.msra.mxu1 %v2301_v4  ;;  %v2304_v16 = vld [vmem:[%s2915_s1 + $0x2c] sm:$0xff]   ;;  %vm2527_vm6 = vmor %vm80_vm2, %vm81_vm3 }
  0x17   :  { %vm335_vm4 = vcmask 1042432   ;;  %vm336_vm5 = vcmask 1046532   ;;  %v278_v14 = vsel %vm181_vm0, %v2300_v3, 0  ;;  %v97_v15 = vshrl.u32 %v2483_v6, 16  ;;  %v67_v17 = vld [vmem:[%s2914_s0 + $0xc] sm:$0xf]  ;;  %1912 = vmatprep.subr.bf16.mxu1 %v2304_v16 }
  0x18   :  { %v86_v12 = vrot.slane %v84_v7, 4  ;;  %v89_v13 = vrot.slane %v87_v8, 5  ;;  %1934 = vmatprep.mubr.msk.bf16.mxu0 %vm174_vm1, %v1710_v10  ;;  %v2502_v18 = vld [vmem:[%s2914_s0 + $0x10] sm:$0xf]  ;;  %v108_v19 = vshrl.u32 %v67_v17, 16  ;;  %v111_v20 = vshll.u32 %v67_v17, 16  ;;  %vm2547_vm7 = vmor %vm335_vm4, %vm336_vm5 }
  0x19   :  { %1927 = vmatpush3.bf16.msra.mxu0 %v2297_v1  ;;  %v342_v21 = vrot.slane %v340_v11, 4  ;;  %v2307_v22 = vld [vmem:[%s2915_s1 + $0x34] sm:$0xff]   ;;  %v121_v26 = vshrl.u32 %v2502_v18, 16  ;;  %v347_v27 = vrot.slane %v2502_v18, 5  ;;  %v2303_v28 = vld [vmem:[%s2915_s1 + $0x48] sm:$0xff]   ;;  %v2309_v29 = vld [vmem:[%s2915_s1 + $0x3c] sm:$0xff]   ;;  %v1711_v42 = vcombine.low %v67_v17, %v2502_v18 }
  0x1a   :  { %1928 = vmatprep.subr.bf16.mxu0 %v2298_v2  ;;  %v90_v23 = vor.u32 %v89_v13, %v86_v12  ;;  %v110_v24 = vrot.slane %v108_v19, 4  ;;  %v113_v25 = vrot.slane %v111_v20, 5  ;;  %1913 = vmatpush3.bf16.msra.mxu1 %v2304_v16  ;;  %v93_v30 = vshll.u32 %v2483_v6, 16  ;;  %v2311_v34 = vld [vmem:[%s2915_s1 + $0x44] ss:$0 sps:$4 sm:$0xff]   ;;  %v2306_v54 = vld [vmem:[%s2915_s1 + $0x50] sm:$0xff]  }
  0x1b   :  { %1914 = vmatprep.subr.bf16.mxu1 %v2307_v22  ;;  %v99_v33 = vrot.slane %v97_v15, 4  ;;  %v78_v35 = vld [vmem:[%s2914_s0 + $0x8] sm:$0x1]  ;;  %v183_v43 = vsel %vm181_vm0, %v2311_v34, 0  ;;  %v79_v45 = vld [vmem:[%s2914_s0 + $0x14] sm:$0x1] }
  0x1c   :  { %v114_v31 = vor.u32 %v113_v25, %v110_v24  ;;  %v91_v32 = vrot.slane %v90_v23, 4  ;;  %v95_v37 = vrot.slane %v93_v30, 5  ;;  %v103_v39 = vshll.u32 %v78_v35, 16  ;;  %v2534_v41 = vld [vmem:[%s2915_s1 + $0x68] ss:$0 sps:$4 sm:$0xff]   ;;  %v48_v63 = vld [vmem:[%s2921_s7] sm:$0xff] }
  0x1d   :  { %1929 = vmatpush3.bf16.msra.mxu0 %v2298_v2  ;;  %v343_v40 = vrot.slane %v78_v35, 5  ;;  %v117_v46 = vshll.u32 %v2502_v18, 16  ;;  %v329_v47 = vld [vmem:[%s2914_s0] sm:$0xe]  ;;  %v123_v51 = vrot.slane %v121_v26, 4  ;;  %v127_v52 = vshll.u32 %v79_v45, 16 }
  0x1e   :  { %1930 = vmatprep.subr.bf16.mxu0 %v2299_v9  ;;  %1915 = vmatpush3.bf16.msra.mxu1 %v2307_v22  ;;  %v115_v38 = vrot.slane %v114_v31, 4  ;;  %v100_v44 = vor.u32 %v99_v33, %v95_v37  ;;  %v96_v49 = vsel %vm2527_vm6, %v91_v32, %v95_v37  ;;  %v105_v50 = vrot.slane %v103_v39, 5  ;;  %v330_v53 = vld [vmem:[%s2914_s0 + $0xc] sm:$0xe]  ;;  %v2308_v1 = vld [vmem:[%s2915_s1 + $0x58] sm:$0xff]   ;;  %v50_v6 = vld [vmem:[%s2921_s7 + $0x10] sm:$0xff] }
  0x1f   :  { %1916 = vmatprep.subr.bf16.mxu1 %v2309_v29  ;;  %v119_v56 = vrot.slane %v117_v46, 5  ;;  %v350_v57 = vrot.slane %v79_v45, 5  ;;  %v1719_v58 = vrot.slane %v329_v47, 9  ;;  %v129_v59 = vrot.slane %v127_v52, 5  ;;  %v49_v0 = vld [vmem:[%s2921_s7 + $0x8] sm:$0xff]  ;;  %v2310_v12 = vld [vmem:[%s2915_s1 + $0x60] sm:$0xff]  }
  0x20   :  { %v101_v55 = vrot.slane %v100_v44, 4  ;;  %v402_v60 = vsel %vm181_vm0, %v2534_v41, 0  ;;  %v344_v61 = vsel %vm2547_vm7, %v342_v21, %v343_v40  ;;  %v1720_v62 = vrot.slane %v330_v53, 9  ;;  %v52_v22 = vld [vmem:[%s2921_s7 + $0x20] sm:$0xff]  ;;  %v53_v18 = vld [vmem:[%s2921_s7 + $0x28] sm:$0xff]  ;;  %v54_v24 = vld [vmem:[%s2921_s7 + $0x30] sm:$0xff] }
  0x21   :  { %1931 = vmatpush3.bf16.msra.mxu0 %v2299_v9  ;;  %v341_v4 = vsel %vm2547_vm7, %v1719_v58, %v340_v11  ;;  %v120_v8 = vsel %vm2527_vm6, %v115_v38, %v119_v56  ;;  %v349_v10 = vrot.slane %v347_v27, 4  ;;  %v51_v11 = vld [vmem:[%s2921_s7 + $0x18] sm:$0xff]  ;;  %v2598_v15 = vpack.c.bf16 %v49_v0, %v48_v63  ;;  %v58_v30 = vld [vmem:[%s2921_s7 + $0x50] sm:$0xff]  ;;  %v60_v33 = vld [vmem:[%s2921_s7 + $0x60] sm:$0xff] }
  0x22   :  { %2285 = vmatprep.subr.msk.bf16.mxu0 %vm181_vm0, %v2300_v3  ;;  %1917 = vmatpush3.bf16.msra.mxu1 %v2309_v29  ;;  %v106_v2 = vsel %vm2527_vm6, %v101_v55, %v105_v50  ;;  %v124_v3 = vor.u32 %v123_v51, %v119_v56  ;;  %v1730_v7 = vcombine.low %v341_v4, %v344_v61  ;;  %v55_v25 = vld [vmem:[%s2921_s7 + $0x38] sm:$0xff]  ;;  %v62_v37 = vld [vmem:[%s2921_s7 + $0x70] sm:$0xff]  ;;  %vm2395_vm8 = vmmov 0  }
  0x23   :  { %2284 = vmatprep.subr.msk.bf16.mxu1 %vm181_vm0, %v2311_v34  ;;  %v1701_v5 = vcombine.low %v96_v49, %v106_v2  ;;  %v2602_v17 = vpack.c.bf16 %v51_v11, %v50_v6  ;;  %v348_v19 = vsel %vm2547_vm7, %v1720_v62, %v347_v27  ;;  %v351_v20 = vsel %vm2547_vm7, %v349_v10, %v350_v57  ;;  %v56_v27 = vld [vmem:[%s2921_s7 + $0x40] sm:$0xff]  ;;  %v59_v31 = vld [vmem:[%s2921_s7 + $0x58] sm:$0xff]  ;;  %v61_v34 = vld [vmem:[%s2921_s7 + $0x68] sm:$0xff] }
  0x24   :  { %v125_v9 = vrot.slane %v124_v3, 4  ;;  %v1731_v21 = vcombine.low %v348_v19, %v351_v20  ;;  %v2622_v23 = vpack.c.bf16 %v53_v18, %v52_v22  ;;  %v2632_v26 = vpack.c.bf16 %v55_v25, %v54_v24  ;;  %v63_v38 = vld [vmem:[%s2921_s7 + $0x78] sm:$0xff] }
  0x25   :  { %1933 = vmatpush3.bf16.msra.mxu0 %v278_v14  ;;  %1920 = vmatprep.mubr.msk.bf16.mxu1 %vm174_vm1, %v1701_v5  ;;  %v2394_v14 = vmov 0.0|0.0   ;;  %v2652_v32 = vpack.c.bf16 %v59_v31, %v58_v30  ;;  %v2662_v35 = vpack.c.bf16 %v61_v34, %v60_v33  ;;  %v2396_v39 = vmov 0.0   ;;  %v458_v31 = vld [vmem:[%s2918_s4] sm:$0x1]  ;;  %v2324_v36 = vld [vmem:[#allocation3 + $0x10] sm:$0xff]  }
  0x26   :  { %1938 = vmatprep.subr.bf16.mxu0 %v2303_v28  ;;  %1919 = vmatpush3.bf16.msra.mxu1 %v183_v43  ;;  %v130_v13 = vsel %vm2527_vm6, %v125_v9, %v129_v59  ;;  %v2674_v40 = vpack.c.bf16 %v63_v38, %v62_v37  ;;  %vm631_vm9 = vcmask 64512   ;;  %v2313_v37 = vld [vmem:[#allocation3 + $0x40] sm:$0xff]   ;;  %vm798_vm10 = vcmask 1040384   ;;  %v2337_v48 = vld [vmem:[#allocation3 + $0xb0] sm:$0xff]  }
  0x27   :  { %2172 = vmatprep.subr.bf16.mxu1 %v2394_v14  ;;  %v1702_v16 = vcombine.low %v120_v8, %v130_v13  ;;  %vm799_vm11 = vsmask.f32 256  ;;  %vm807_vm12 = vsmask.f32 7938  ;;  %vm827_vm15 = vsmask.f32 4368 }
  0x28   :  { %1935 = vmatmul.mubr.msk.bf16.vlgmr.msra.gmra.mrb[0].mxu0 %vm174_vm1, %v1711_v42  ;;  %vm2756_vm13 = vmand %vm798_vm10, %vm799_vm11 }
  0x29   :  { %1939 = vmatpush3.bf16.msra.mxu0 %v2303_v28  ;;  %1948 = vmatprep.mubr.msk.bf16.mxu0 %vm174_vm1, %v1730_v7  ;;  %v57_v28 = vld [vmem:[%s2921_s7 + $0x48] sm:$0xff]  ;;  %vm808_vm14 = vmand %vm798_vm10, %vm807_vm12 }
  0x2a   :  { %1940 = vmatprep.subr.bf16.mxu0 %v2306_v54  ;;  %1921 = vmatmul.mubr.msk.bf16.vlgmr.msra.gmra.mrb[0].mxu1 %vm174_vm1, %v1702_v16  ;;  %v2642_v29 = vpack.c.bf16 %v57_v28, %v56_v27  ;;  %v457_v27 = vld [vmem:[%s2917_s3] sm:$0x1]  ;;  %vm2783_vm2 = vmand %vm181_vm0, %vm807_vm12 }
  0x2b   :  { %2174 = vmatpush3.bf16.msra.mxu1 %v2598_v15  ;;  %1984 = vmatprep.mubr.msk.f32.mxu1 %vm2395_vm8, %v2396_v39 }
  0x2c   :  { %2175 = vmatprep.subr.bf16.mxu1 %v2394_v14 }
  0x2d   :  { %1941 = vmatpush3.bf16.msra.mxu0 %v2306_v54 }
  0x2e   :  { %1942 = vmatprep.subr.bf16.mxu0 %v2308_v1 }
  0x2f   :  { %2177 = vmatpush3.bf16.msra.mxu1 %v2602_v17 }
  0x30   :  { %2178 = vmatprep.subr.bf16.mxu1 %v2394_v14 }
  0x31   :  { %1943 = vmatpush3.bf16.msra.mxu0 %v2308_v1 }
  0x32   :  { %1944 = vmatprep.subr.bf16.mxu0 %v2310_v12 }
  0x33   :  { %2180 = vmatpush3.bf16.msra.mxu1 %v2622_v23 }
  0x34   :  { %2181 = vmatprep.subr.bf16.mxu1 %v2394_v14 }
  0x35   :  { %1945 = vmatpush3.bf16.msra.mxu0 %v2310_v12  ;;  %v2740_v12 = vld [vmem:[%s2922_s8] sm:$0xff] }
  0x36   :  { %2286 = vmatprep.subr.msk.bf16.mxu0 %vm181_vm0, %v2534_v41 }
  0x37   :  { %2183 = vmatpush3.bf16.msra.mxu1 %v2632_v26 }
  0x38   :  { %2184 = vmatprep.subr.bf16.mxu1 %v2394_v14 }
  0x39   :  { %1947 = vmatpush3.bf16.msra.mxu0 %v402_v60 }
  0x3a   :  { %2022 = vmatprep.subr.mxu0 %v2396_v39 }
  0x3b   :  { %2186 = vmatpush3.bf16.msra.mxu1 %v2642_v29 }
  0x3c   :  { %1949 = vmatmul.mubr.msk.bf16.vlgmr.msra.gmra.mrb[0].mxu0 %vm174_vm1, %v1731_v21  ;;  %2187 = vmatprep.subr.bf16.mxu1 %v2394_v14  ;;  %vm2777_vm1 = vmor %vm799_vm11, %vm827_vm15 }
  0x3d   :  { %2024 = vmatprep.mubr.msk.f32.mxu0 %vm2395_vm8, %v2396_v39  ;;  %2023 = vmatpush3.msra.mxu0 %v2740_v12 }
  0x3e   :  { %2027 = vmatprep.subr.mxu0 %v2396_v39 }
  0x3f   :  { %2189 = vmatpush3.bf16.msra.mxu1 %v2652_v32 }
  0x40   :  { %2190 = vmatprep.subr.bf16.mxu1 %v2394_v14 }
  0x43   :  { %2192 = vmatpush3.bf16.msra.mxu1 %v2662_v35 }
  0x44   :  { %2193 = vmatprep.subr.bf16.mxu1 %v2394_v14 }
  0x47   :  { %2195 = vmatpush3.bf16.msra.mxu1 %v2674_v40 }
  0x48   :  { %2196 = vmatprep.subr.bf16.mxu1 %v2394_v14 }
  0xfd   :  { %v1922_v41 = vpop.f32.mrb[0].mxu1 }
  0xfe   :  { %v219_v42 = vpop.f32.mrb[1].mxu1 }
  0xff   :  { %v1923_v43 = vpop.f32.mrb[2].mxu1 }
 0x100   :  { %v222_v44 = vpop.f32.mrb[3].mxu1 }
 0x10f   :  { %v1950_v45 = vpop.f32.mrb[0].mxu0 }
 0x110   :  { %v2681_v46 = vadd.f32 %v1950_v45, %v1922_v41  ;;  %v438_v47 = vpop.f32.mrb[1].mxu0  ;;  %v801_v41 = vld [vmem:[#allocation2] sm:$0x1]  ;;  %v809_v45 = vld [vmem:[#allocation2 + $0x8] sm:$0x1] }
 0x111   :  { %v2683_v49 = vadd.f32 %v438_v47, %v219_v42  ;;  %v1951_v50 = vpop.f32.mrb[2].mxu0  ;;  %v804_v42 = vld [vmem:[#allocation2 + $0xc] sm:$0x1]  ;;  %v812_v47 = vld [vmem:[#allocation2 + $0x14] sm:$0x1] }
 0x112   :  { %v2685_v51 = vadd.f32 %v1951_v50, %v1923_v43  ;;  %v441_v52 = vpop.f32.mrb[3].mxu0  ;;  %v470_v2 = vmul.f32 %v2681_v46, %v2681_v46  ;;  %v802_v43 = vsel %vm2756_vm13, 0, %v801_v41  ;;  %v810_v50 = vsel %vm808_vm14, 0, %v809_v45 }
 0x113   :  { %v2687_v53 = vadd.f32 %v441_v52, %v222_v44  ;;  %v468_v62 = vmul.f32 %v2683_v49, %v2683_v49  ;;  %v805_v44 = vsel %vm2756_vm13, 0, %v804_v42  ;;  %803 = vst [vmem:[#allocation2] sm:$0x1] %v802_v43  ;;  %v813_v52 = vsel %vm808_vm14, 0, %v812_v47  ;;  %811 = vst [vmem:[#allocation2 + $0x8] sm:$0x1] %v810_v50 }
 0x114   :  { %v471_v4 = vmul.f32 %v2685_v51, %v2685_v51  ;;  %806 = vst [vmem:[#allocation2 + $0xc] sm:$0x1] %v805_v44  ;;  %814 = vst [vmem:[#allocation2 + $0x14] sm:$0x1] %v813_v52 }
 0x115   :  { %v459_v54 = vadd.f32 %v2687_v53, %v2683_v49  ;;  %v469_v60 = vmul.f32 %v2687_v53, %v2687_v53 }
 0x117   :  { %v460_v55 = vadd.f32 %v2681_v46, %v459_v54  ;;  %v472_v0 = vadd.f32 %v469_v60, %v468_v62  ;;  %v2314_v54 = vld [vmem:[#allocation3 + $0x48] sm:$0xff]   ;;  %v2320_v60 = vld [vmem:[#allocation3 + $0x78] sm:$0xff]   ;;  %v778_v62 = vlaneseq }
 0x119   :  { %v461_v56 = vadd.f32 %v2685_v51, %v460_v55  ;;  %v473_v3 = vadd.f32 %v472_v0, %v470_v2  ;;  %v2315_v55 = vld [vmem:[#allocation3 + $0x50] sm:$0xff]  }
 0x11a   :  { %v871_v41 = vld [vmem:[#allocation2] sm:$0xf]  ;;  %v875_v50 = vld [vmem:[#allocation2 + $0x8] sm:$0x1] }
 0x11b   :  { %v462_v57 = vrot.slane %v461_v56, 4  ;;  %v474_v5 = vadd.f32 %v473_v3, %v471_v4 }
 0x11d   :  { %v463_v58 = vadd.f32 %v462_v57, %v461_v56  ;;  %v475_v7 = vrot.slane %v474_v5, 4  ;;  %v2316_v56 = vld [vmem:[#allocation3 + $0x58] sm:$0xff]   ;;  %v2317_v57 = vld [vmem:[#allocation3 + $0x60] sm:$0xff]  }
 0x11f   :  { %v464_v59 = vrot.slane %v463_v58, 2  ;;  %v476_v8 = vadd.f32 %v475_v7, %v474_v5 }
 0x121   :  { %v465_v61 = vadd.f32 %v464_v59, %v463_v58  ;;  %v477_v9 = vrot.slane %v476_v8, 2  ;;  %v2318_v58 = vld [vmem:[#allocation3 + $0x68] sm:$0xff]   ;;  %v2319_v59 = vld [vmem:[#allocation3 + $0x70] sm:$0xff]  }
 0x123   :  { %v466_v63 = vrot.slane %v465_v61, 1  ;;  %v478_v10 = vadd.f32 %v477_v9, %v476_v8 }
 0x125   :  { %v467_v1 = vadd.f32 %v466_v63, %v465_v61  ;;  %v479_v6 = vrot.slane %v478_v10, 1  ;;  %v2765_v61 = vld [vmem:[#allocation3] sm:$0xff]   ;;  %v779_v63 = vshrl.u32 %v778_v62, 7 }
 0x127   :  { %1985 = vmatmul.mubr.f32.vlgmr.msra.gmra.mrb[4].mxu1 %v467_v1  ;;  %v480_v11 = vadd.f32 %v479_v6, %v478_v10  ;;  %v2768_v0 = vsub.s32 0, %v779_v63 }
 0x128   :  { %2198 = vmatpush3.bf16.msra.mxu1 %v2598_v15  ;;  %2019 = vmatprep.mubr.msk.f32.mxu1 %vm2395_vm8, %v2396_v39 }
 0x129   :  { %2199 = vmatprep.subr.bf16.mxu1 %v2394_v14 }
 0x12c   :  { %2201 = vmatpush3.bf16.msra.mxu1 %v2602_v17 }
 0x12d   :  { %2202 = vmatprep.subr.bf16.mxu1 %v2394_v14 }
 0x130   :  { %2204 = vmatpush3.bf16.msra.mxu1 %v2622_v23 }
 0x131   :  { %2205 = vmatprep.subr.bf16.mxu1 %v2394_v14 }
 0x134   :  { %2207 = vmatpush3.bf16.msra.mxu1 %v2632_v26 }
 0x135   :  { %2208 = vmatprep.subr.bf16.mxu1 %v2394_v14 }
 0x138   :  { %2210 = vmatpush3.bf16.msra.mxu1 %v2642_v29 }
 0x139   :  { %2211 = vmatprep.subr.bf16.mxu1 %v2394_v14 }
 0x13c   :  { %2213 = vmatpush3.bf16.msra.mxu1 %v2652_v32 }
 0x13d   :  { %2214 = vmatprep.subr.bf16.mxu1 %v2394_v14 }
 0x140   :  { %2216 = vmatpush3.bf16.msra.mxu1 %v2662_v35 }
 0x141   :  { %2217 = vmatprep.subr.bf16.mxu1 %v2394_v14 }
 0x144   :  { %2219 = vmatpush3.bf16.msra.mxu1 %v2674_v40 }
 0x145   :  { %2220 = vmatprep.subr.bf16.mxu1 %v2394_v14 }
 0x147   :  { %2020 = vmatmul.mubr.f32.vlgmr.msra.gmra.mrb[6].mxu1 %v480_v11 }
 0x148   :  { %2222 = vmatpush3.bf16.msra.mxu1 %v2598_v15  ;;  %2124 = vmatprep.mubr.msk.f32.mxu1 %vm2395_vm8, %v2396_v39 }
 0x149   :  { %2223 = vmatprep.subr.bf16.mxu1 %v2394_v14 }
 0x14c   :  { %2225 = vmatpush3.bf16.msra.mxu1 %v2602_v17 }
 0x14d   :  { %2226 = vmatprep.subr.bf16.mxu1 %v2394_v14 }
 0x150   :  { %2228 = vmatpush3.bf16.msra.mxu1 %v2622_v23 }
 0x151   :  { %2229 = vmatprep.subr.bf16.mxu1 %v2394_v14 }
 0x154   :  { %2231 = vmatpush3.bf16.msra.mxu1 %v2632_v26 }
 0x155   :  { %2232 = vmatprep.subr.bf16.mxu1 %v2394_v14 }
 0x158   :  { %2234 = vmatpush3.bf16.msra.mxu1 %v2642_v29 }
 0x159   :  { %2235 = vmatprep.subr.bf16.mxu1 %v2394_v14 }
 0x15c   :  { %2237 = vmatpush3.bf16.msra.mxu1 %v2652_v32 }
 0x15d   :  { %2238 = vmatprep.subr.bf16.mxu1 %v2394_v14 }
 0x160   :  { %2240 = vmatpush3.bf16.msra.mxu1 %v2662_v35 }
 0x161   :  { %2241 = vmatprep.subr.bf16.mxu1 %v2394_v14 }
 0x164   :  { %2243 = vmatpush3.bf16.msra.mxu1 %v2674_v40 }
 0x165   :  { %2244 = vmatprep.subr.bf16.mxu1 %v2394_v14 }
 0x1fa   :  { %v547_v13 = vpop.f32.mrb[4].mxu1 }
 0x1fb   :  { %v1986_v16 = vpop.f32.mrb[5].mxu1  ;;  %v622_v19 = vmul.f32 0.001953125, %v547_v13 }
 0x1fd   :  { %v624_v21 = vmul.f32 %v622_v19, %v622_v19 }
 0x21a   :  { %v617_v20 = vpop.f32.mrb[6].mxu1 }
 0x21b   :  { %v623_v22 = vmul.f32 0.001953125, %v617_v20  ;;  %v2021_v18 = vpop.f32.mrb[7].mxu1 }
 0x21d   :  { %v625_v24 = vsub.f32 %v623_v22, %v624_v21 }
 0x21f   :  { %v626_v25 = vadd.f32 1e-05, %v625_v24 }
 0x221   :  { %2339 = vrsqrt.f32 %v626_v25 }
 0x22b   :  { %v2340_v28 = vpop.eup %2339 }
 0x22c   :  { %v628_v30 = vmul.f32 %v2340_v28, %v457_v27 }
 0x22e   :  { %2025 = vmatmul.mubr.msk.f32.vlgmr.msra.gmra.mrb[4].mxu0 %vm631_vm9, %v628_v30  ;;  %v629_v33 = vmul.f32 %v628_v30, %v622_v19 }
 0x22f   :  { %2028 = vmatpush3.msra.mxu0 %v2740_v12  ;;  %2029 = vmatprep.mubr.msk.f32.mxu0 %vm2395_vm8, %v2396_v39 }
 0x230   :  { %v630_v34 = vsub.f32 %v458_v31, %v629_v33  ;;  %2032 = vmatprep.subr.bf16.mxu0 %v2313_v37 }
 0x232   :  { %2030 = vmatmul.mubr.msk.f32.vlgmr.msra.gmra.mrb[6].mxu0 %vm631_vm9, %v630_v34 }
 0x233   :  { %2033 = vmatpush3.bf16.msra.mxu0 %v2313_v37 }
 0x234   :  { %2034 = vmatprep.subr.bf16.mxu0 %v2314_v54 }
 0x237   :  { %2035 = vmatpush3.bf16.msra.mxu0 %v2314_v54 }
 0x238   :  { %2036 = vmatprep.subr.bf16.mxu0 %v2315_v55 }
 0x23b   :  { %2037 = vmatpush3.bf16.msra.mxu0 %v2315_v55 }
 0x23c   :  { %2038 = vmatprep.subr.bf16.mxu0 %v2316_v56 }
 0x23f   :  { %2039 = vmatpush3.bf16.msra.mxu0 %v2316_v56 }
 0x240   :  { %2040 = vmatprep.subr.bf16.mxu0 %v2317_v57 }
 0x243   :  { %2041 = vmatpush3.bf16.msra.mxu0 %v2317_v57  ;;  %v878_v57 = vld [vmem:[#allocation2 + $0xc] sm:$0xf] }
 0x244   :  { %2042 = vmatprep.subr.bf16.mxu0 %v2318_v58 }
 0x247   :  { %2043 = vmatpush3.bf16.msra.mxu0 %v2318_v58  ;;  %v882_v58 = vld [vmem:[#allocation2 + $0x14] sm:$0x1] }
 0x248   :  { %2044 = vmatprep.subr.bf16.mxu0 %v2319_v59 }
 0x24b   :  { %2045 = vmatpush3.bf16.msra.mxu0 %v2319_v59 }
 0x24c   :  { %2046 = vmatprep.subr.bf16.mxu0 %v2320_v60 }
 0x24f   :  { %2047 = vmatpush3.bf16.msra.mxu0 %v2320_v60 }
 0x250   :  { %2052 = vmatprep.subr.bf16.mxu0 %v2765_v61 }
 0x301   :  { %v701_v1 = vpop.f32.mrb[4].mxu0 }
 0x302   :  { %v781_v2 = vrot.slane %v701_v1, %v2768_v0  ;;  %v2026_v3 = vpop.f32.mrb[5].mxu0 }
 0x304   :  { %v782_v4 = vmul.f32 %v2683_v49, %v781_v2  ;;  %v783_v7 = vmul.f32 %v2687_v53, %v781_v2  ;;  %v784_v8 = vmul.f32 %v2681_v46, %v781_v2  ;;  %v785_v9 = vmul.f32 %v2685_v51, %v781_v2 }
 0x305   :  { %v774_v5 = vpop.f32.mrb[6].mxu0 }
 0x306   :  { %v789_v10 = vrot.slane %v774_v5, %v2768_v0  ;;  %v2031_v6 = vpop.f32.mrb[7].mxu0 }
 0x308   :  { %v790_v11 = vadd.f32 %v789_v10, %v782_v4  ;;  %v791_v13 = vadd.f32 %v789_v10, %v783_v7  ;;  %v792_v16 = vadd.f32 %v789_v10, %v784_v8  ;;  %v793_v19 = vadd.f32 %v789_v10, %v785_v9 }
 0x30a   :  { %v794_v20 = vmax.f32 %v790_v11, 0.0  ;;  %v795_v21 = vmax.f32 %v791_v13, 0.0  ;;  %v796_v22 = vmax.f32 %v792_v16, 0.0  ;;  %v797_v18 = vmax.f32 %v793_v19, 0.0 }
 0x30c   :  { %v1779_v24 = vpack.c.bf16 %v794_v20, %v794_v20  ;;  %v1780_v49 = vpack.c.bf16 %v795_v21, %v795_v21  ;;  %v1781_v25 = vpack.c.bf16 %v796_v22, %v796_v22  ;;  %v1782_v27 = vpack.c.bf16 %v797_v18, %v797_v18 }
 0x30e   :  { %v830_v53 = vshrl.u32 %v1779_v24, 16  ;;  %v838_v46 = vshrl.u32 %v1780_v49, 16  ;;  %v847_v28 = vshrl.u32 %v1781_v25, 16  ;;  %v855_v51 = vshrl.u32 %v1782_v27, 16 }
 0x30f   :  { %v833_v33 = vshll.u32 %v1779_v24, 16  ;;  %v841_v37 = vshll.u32 %v1780_v49, 16  ;;  %v850_v43 = vshll.u32 %v1781_v25, 16  ;;  %v858_v45 = vshll.u32 %v1782_v27, 16 }
 0x310   :  { %v832_v31 = vrot.slane %v830_v53, 7  ;;  %v840_v34 = vrot.slane %v838_v46, 7  ;;  %v849_v42 = vrot.slane %v847_v28, 7  ;;  %v857_v44 = vrot.slane %v855_v51, 7 }
 0x312   :  { %v835_v52 = vor.u32 %v833_v33, %v832_v31  ;;  %v836_v54 = vrot.slane %v832_v31, 4  ;;  %v843_v55 = vor.u32 %v841_v37, %v840_v34  ;;  %v845_v56 = vrot.slane %v840_v34, 4 }
 0x313   :  { %v852_v59 = vor.u32 %v850_v43, %v849_v42  ;;  %v853_v60 = vrot.slane %v849_v42, 4  ;;  %v860_v62 = vor.u32 %v858_v45, %v857_v44  ;;  %v862_v63 = vrot.slane %v857_v44, 4 }
 0x314   :  { %v844_v1 = vsel %vm2777_vm1, %v836_v54, %v843_v55  ;;  %v872_v2 = vsel %vm2783_vm2, %v835_v52, %v871_v41  ;;  %v876_v3 = vsel %vm2756_vm13, %v845_v56, %v875_v50 }
 0x315   :  { %v861_v4 = vsel %vm2777_vm1, %v853_v60, %v860_v62  ;;  %873 = vst [vmem:[#allocation2] sm:$0xf] %v872_v2  ;;  %874 = vst [vmem:[#allocation2 + $0x4] sm:$0xf] %v844_v1  ;;  %v879_v5 = vsel %vm2783_vm2, %v852_v59, %v878_v57  ;;  %v883_v7 = vsel %vm2756_vm13, %v862_v63, %v882_v58 }
 0x316   :  { %877 = vst [vmem:[#allocation2 + $0x8] sm:$0x1] %v876_v3  ;;  %880 = vst [vmem:[#allocation2 + $0xc] sm:$0xf] %v879_v5  ;;  %v2323_v5 = vld [vmem:[#allocation3 + $0x8] sm:$0xff]  }
 0x317   :  { %881 = vst [vmem:[#allocation2 + $0x10] sm:$0xf] %v861_v4  ;;  %884 = vst [vmem:[#allocation2 + $0x14] sm:$0x1] %v883_v7 }
 0x31c   :  { %v885_v8 = vld [vmem:[#allocation2] sm:$0xf]  ;;  %v2799_v9 = vld [vmem:[#allocation2 + $0x4] sm:$0xf] }
 0x31d   :  { %v2801_v10 = vld [vmem:[#allocation2 + $0x8] sm:$0x1]  ;;  %v908_v6 = vshrl.u32 %v885_v8, 16  ;;  %v911_v11 = vshll.u32 %v885_v8, 16  ;;  %v917_v13 = vshll.u32 %v2799_v9, 16  ;;  %v921_v16 = vshrl.u32 %v2799_v9, 16 }
 0x31e   :  { %v2805_v19 = vld [vmem:[#allocation2 + $0xc] sm:$0xf]  ;;  %v927_v20 = vshll.u32 %v2801_v10, 16  ;;  %v2808_v38 = vld [vmem:[#allocation2 + $0x10] sm:$0xf] }
 0x31f   :  { %v932_v21 = vshrl.u32 %v2805_v19, 16  ;;  %v910_v22 = vrot.slane %v908_v6, 4  ;;  %v913_v18 = vrot.slane %v911_v11, 5  ;;  %v919_v24 = vrot.slane %v917_v13, 5  ;;  %v906_v25 = vld [vmem:[#allocation2 + $0x14] sm:$0x1] }
 0x320   :  { %v923_v49 = vrot.slane %v921_v16, 4  ;;  %v935_v53 = vshll.u32 %v2805_v19, 16  ;;  %v941_v46 = vshll.u32 %v2808_v38, 16  ;;  %v945_v30 = vshrl.u32 %v2808_v38, 16  ;;  %v1187_v31 = vld [vmem:[#allocation2 + $0xc] sm:$0xe] }
 0x321   :  { %v934_v27 = vrot.slane %v932_v21, 4  ;;  %v914_v28 = vor.u32 %v913_v18, %v910_v22  ;;  %v929_v33 = vrot.slane %v927_v20, 5  ;;  %v951_v44 = vshll.u32 %v906_v25, 16  ;;  %v2325_v11 = vld [vmem:[#allocation3 + $0x18] sm:$0xff]   ;;  %v2326_v13 = vld [vmem:[#allocation3 + $0x20] sm:$0xff]   ;;  %v2327_v16 = vld [vmem:[#allocation3 + $0x28] sm:$0xff]  }
 0x322   :  { %v924_v51 = vor.u32 %v923_v49, %v919_v24  ;;  %v937_v34 = vrot.slane %v935_v53, 5  ;;  %v943_v37 = vrot.slane %v941_v46, 5  ;;  %v947_v43 = vrot.slane %v945_v30, 4  ;;  %v2328_v20 = vld [vmem:[#allocation3 + $0x30] sm:$0xff]   ;;  %v1186_v21 = vld [vmem:[#allocation2] sm:$0xe] }
 0x323   :  { %v915_v41 = vrot.slane %v914_v28, 4  ;;  %v1766_v47 = vrot.slane %v1187_v31, 9  ;;  %v1201_v55 = vrot.slane %v2808_v38, 5  ;;  %v953_v59 = vrot.slane %v951_v44, 5  ;;  %v2331_v18 = vld [vmem:[#allocation3 + $0x80] sm:$0xff]   ;;  %v2332_v53 = vld [vmem:[#allocation3 + $0x88] sm:$0xff]  }
 0x324   :  { %v925_v42 = vrot.slane %v924_v51, 4  ;;  %v938_v45 = vor.u32 %v937_v34, %v934_v27  ;;  %v948_v54 = vor.u32 %v947_v43, %v943_v37  ;;  %v1204_v62 = vrot.slane %v906_v25, 5  ;;  %v2333_v28 = vld [vmem:[#allocation3 + $0x90] sm:$0xff]   ;;  %v2335_v51 = vld [vmem:[#allocation3 + $0xa0] sm:$0xff]  }
 0x325   :  { %v920_v50 = vsel %vm2527_vm6, %v915_v41, %v919_v24  ;;  %v1203_v60 = vrot.slane %v1201_v55, 4  ;;  %v2825_v2 = vsel %vm2547_vm7, %v1766_v47, %v1201_v55  ;;  %v1755_v6 = vcombine.low %v885_v8, %v2799_v9 }
 0x326   :  { %v930_v52 = vsel %vm2527_vm6, %v925_v42, %v929_v33  ;;  %v939_v57 = vrot.slane %v938_v45, 4  ;;  %v949_v58 = vrot.slane %v948_v54, 4  ;;  %v1194_v8 = vrot.slane %v2799_v9, 5 }
 0x327   :  { %v1745_v56 = vcombine.low %v920_v50, %v930_v52  ;;  %v2829_v3 = vsel %vm2547_vm7, %v1203_v60, %v1204_v62  ;;  %v1765_v24 = vrot.slane %v1186_v21, 9  ;;  %v1197_v49 = vrot.slane %v2801_v10, 5  ;;  %v2334_v10 = vld [vmem:[#allocation3 + $0x98] sm:$0xff]  }
 0x328   :  { %v944_v63 = vsel %vm2527_vm6, %v939_v57, %v943_v37  ;;  %v954_v1 = vsel %vm2527_vm6, %v949_v58, %v953_v59  ;;  %v1768_v7 = vcombine.low %v2825_v2, %v2829_v3  ;;  %v1196_v22 = vrot.slane %v1194_v8, 4 }
 0x329   :  { %2048 = vmatprep.mubr.bf16.mxu0 %v1745_v56  ;;  %v1746_v4 = vcombine.low %v944_v63, %v954_v1  ;;  %v1756_v27 = vcombine.low %v2805_v19, %v2808_v38  ;;  %v1195_v9 = vsel %vm2547_vm7, %v1765_v24, %v1194_v8  ;;  %v2336_v19 = vld [vmem:[#allocation3 + $0xa8] sm:$0xff]   ;;  %v2338_v38 = vld [vmem:[#allocation3 + $0xb8] sm:$0xff]  }
 0x32a   :  { %v1198_v25 = vsel %vm2547_vm7, %v1196_v22, %v1197_v49 }
 0x32b   :  { %2049 = vmatmul.mubr.bf16.vlgmr.msra.gmra.mrb[8].mxu0 %v1746_v4  ;;  %v1767_v46 = vcombine.low %v1195_v9, %v1198_v25 }
 0x32c   :  { %2053 = vmatpush3.bf16.msra.mxu0 %v2765_v61  ;;  %2068 = vmatprep.mubr.bf16.mxu0 %v1755_v6  ;;  %v2329_v61 = vld [vmem:[#allocation3 + $0x38] sm:$0xff]  }
 0x32d   :  { %2054 = vmatprep.subr.bf16.mxu0 %v2323_v5 }
 0x330   :  { %2055 = vmatpush3.bf16.msra.mxu0 %v2323_v5  ;;  %v1332_v5 = vld [vmem:[%s2919_s5] sm:$0x1]  ;;  %s2397_s5 = smov [#allocation6]  }
 0x331   :  { %2056 = vmatprep.subr.bf16.mxu0 %v2324_v36 }
 0x334   :  { %2057 = vmatpush3.bf16.msra.mxu0 %v2324_v36  ;;  %v1333_v36 = vld [vmem:[%s2920_s6] sm:$0x1]  ;;  %s1680_s6 = sshll.u32 %s2397_s5, 4  ;;  %s1681_s6 = int_to_ptr.vmem [resolvable:$true] %s1680_s6 }
 0x335   :  { %2058 = vmatprep.subr.bf16.mxu0 %v2325_v11  ;;  %s2365_s15 = scalar_lea.vmem %s1681_s6, 512  ;;  %p2370_p9 = scmp.lt.s32.totalorder %s1681_s6, %s1681_s6 }
 0x336   :  { %p2366_p8 = scmp.ne.s32.totalorder %s1681_s6, %s2365_s15  ;;  %p2371_p10 = scmp.lt.s32.totalorder %s2365_s15, %s2365_s15 }
 0x338   :  { %2059 = vmatpush3.bf16.msra.mxu0 %v2325_v11  ;;  %p2372_p11 = por %p2371_p10, %p2370_p9 }
 0x339   :  { %2060 = vmatprep.subr.bf16.mxu0 %v2326_v13 }
 0x33a   :  { %p2373_p12 = pnand %p2372_p11, %p2366_p8 }
 0x33c   :  { %2061 = vmatpush3.bf16.msra.mxu0 %v2326_v13 }
 0x33d   :  { %2062 = vmatprep.subr.bf16.mxu0 %v2327_v16 }
 0x340   :  { %2063 = vmatpush3.bf16.msra.mxu0 %v2327_v16 }
 0x341   :  { %2064 = vmatprep.subr.bf16.mxu0 %v2328_v20 }
 0x344   :  { %2065 = vmatpush3.bf16.msra.mxu0 %v2328_v20 }
 0x345   :  { %2066 = vmatprep.subr.bf16.mxu0 %v2329_v61 }
 0x348   :  { %2067 = vmatpush3.bf16.msra.mxu0 %v2329_v61 }
 0x349   :  { %2072 = vmatprep.subr.bf16.mxu0 %v2331_v18 }
 0x34b   :  { %2069 = vmatmul.mubr.bf16.vlgmr.msra.gmra.mrb[8].mxu0 %v1756_v27 }
 0x34c   :  { %2073 = vmatpush3.bf16.msra.mxu0 %v2331_v18  ;;  %2088 = vmatprep.mubr.bf16.mxu0 %v1767_v46 }
 0x34d   :  { %2074 = vmatprep.subr.bf16.mxu0 %v2332_v53 }
 0x350   :  { %2075 = vmatpush3.bf16.msra.mxu0 %v2332_v53 }
 0x351   :  { %2076 = vmatprep.subr.bf16.mxu0 %v2333_v28 }
 0x354   :  { %2077 = vmatpush3.bf16.msra.mxu0 %v2333_v28 }
 0x355   :  { %2078 = vmatprep.subr.bf16.mxu0 %v2334_v10 }
 0x358   :  { %2079 = vmatpush3.bf16.msra.mxu0 %v2334_v10 }
 0x359   :  { %2080 = vmatprep.subr.bf16.mxu0 %v2335_v51 }
 0x35c   :  { %2081 = vmatpush3.bf16.msra.mxu0 %v2335_v51 }
 0x35d   :  { %2082 = vmatprep.subr.bf16.mxu0 %v2336_v19 }
 0x360   :  { %2083 = vmatpush3.bf16.msra.mxu0 %v2336_v19 }
 0x361   :  { %2084 = vmatprep.subr.bf16.mxu0 %v2337_v48 }
 0x364   :  { %2085 = vmatpush3.bf16.msra.mxu0 %v2337_v48 }
 0x365   :  { %2086 = vmatprep.subr.bf16.mxu0 %v2338_v38 }
 0x368   :  { %2087 = vmatpush3.bf16.msra.mxu0 %v2338_v38 }
 0x36b   :  { %2089 = vmatmul.mubr.bf16.vlgmr.msra.gmra.mrb[8].mxu0 %v1768_v7 }
 0x43e   :  { %v2843_v30 = vpop.f32.mrb[8].mxu0 }
 0x43f   :  { %v2845_v31 = vpop.f32.mrb[9].mxu0  ;;  %v1345_v43 = vmul.f32 %v2843_v30, %v2843_v30 }
 0x440   :  { %v2847_v33 = vpop.f32.mrb[10].mxu0  ;;  %v1343_v37 = vmul.f32 %v2845_v31, %v2845_v31 }
 0x441   :  { %v2849_v34 = vpop.f32.mrb[11].mxu0  ;;  %v1346_v47 = vmul.f32 %v2847_v33, %v2847_v33 }
 0x442   :  { %v1334_v41 = vadd.f32 %v2849_v34, %v2845_v31  ;;  %v1344_v42 = vmul.f32 %v2849_v34, %v2849_v34 }
 0x444   :  { %v1335_v44 = vadd.f32 %v2843_v30, %v1334_v41  ;;  %v1347_v45 = vadd.f32 %v1344_v42, %v1343_v37 }
 0x446   :  { %v1336_v50 = vadd.f32 %v2847_v33, %v1335_v44  ;;  %v1348_v52 = vadd.f32 %v1347_v45, %v1345_v43 }
 0x448   :  { %v1337_v54 = vrot.slane %v1336_v50, 4  ;;  %v1349_v55 = vadd.f32 %v1348_v52, %v1346_v47 }
 0x44a   :  { %v1338_v56 = vadd.f32 %v1337_v54, %v1336_v50  ;;  %v1350_v62 = vrot.slane %v1349_v55, 4 }
 0x44c   :  { %v1339_v57 = vrot.slane %v1338_v56, 2  ;;  %v1351_v63 = vadd.f32 %v1350_v62, %v1349_v55 }
 0x44e   :  { %v1340_v58 = vadd.f32 %v1339_v57, %v1338_v56 }
 0x450   :  { %v1341_v59 = vrot.slane %v1340_v58, 1 }
 0x452   :  { %v1342_v60 = vadd.f32 %v1341_v59, %v1340_v58 }
 0x454   :  { %2125 = vmatmul.mubr.f32.vlgmr.msra.gmra.mrb[8].mxu1 %v1342_v60 }
 0x455   :  { %2246 = vmatpush3.bf16.msra.mxu1 %v2598_v15  ;;  %2159 = vmatprep.mubr.msk.f32.mxu1 %vm2395_vm8, %v2396_v39  ;;  %v1352_v15 = vrot.slane %v1351_v63, 2 }
 0x456   :  { %2247 = vmatprep.subr.bf16.mxu1 %v2394_v14 }
 0x459   :  { %2249 = vmatpush3.bf16.msra.mxu1 %v2602_v17  ;;  %v1353_v17 = vadd.f32 %v1352_v15, %v1351_v63 }
 0x45a   :  { %2250 = vmatprep.subr.bf16.mxu1 %v2394_v14 }
 0x45d   :  { %2252 = vmatpush3.bf16.msra.mxu1 %v2622_v23  ;;  %v1354_v23 = vrot.slane %v1353_v17, 1 }
 0x45e   :  { %2253 = vmatprep.subr.bf16.mxu1 %v2394_v14 }
 0x461   :  { %2255 = vmatpush3.bf16.msra.mxu1 %v2632_v26  ;;  %v1355_v26 = vadd.f32 %v1354_v23, %v1353_v17 }
 0x462   :  { %2256 = vmatprep.subr.bf16.mxu1 %v2394_v14 }
 0x465   :  { %2258 = vmatpush3.bf16.msra.mxu1 %v2642_v29 }
 0x466   :  { %2259 = vmatprep.subr.bf16.mxu1 %v2394_v14 }
 0x469   :  { %2261 = vmatpush3.bf16.msra.mxu1 %v2652_v32 }
 0x46a   :  { %2262 = vmatprep.subr.bf16.mxu1 %v2394_v14 }
 0x46d   :  { %2264 = vmatpush3.bf16.msra.mxu1 %v2662_v35 }
 0x46e   :  { %2265 = vmatprep.subr.bf16.mxu1 %v2394_v14 }
 0x471   :  { %2267 = vmatpush3.bf16.msra.mxu1 %v2674_v40 }
 0x472   :  { %2162 = vmatprep.subr.mxu1 %v2396_v39 }
 0x474   :  { %2160 = vmatmul.mubr.f32.vlgmr.msra.gmra.mrb[10].mxu1 %v1355_v26 }
 0x475   :  { %2163 = vmatpush3.msra.mxu1 %v2740_v12  ;;  %2164 = vmatprep.mubr.msk.f32.mxu1 %vm2395_vm8, %v2396_v39 }
 0x476   :  { %2167 = vmatprep.subr.mxu1 %v2396_v39 }
 0x527   :  { %v1422_v29 = vpop.f32.mrb[8].mxu1 }
 0x528   :  { %v2126_v32 = vpop.f32.mrb[9].mxu1  ;;  %v1496_v1 = vmul.f32 0.001953125, %v1422_v29 }
 0x52a   :  { %v1498_v2 = vmul.f32 %v1496_v1, %v1496_v1 }
 0x547   :  { %v1492_v35 = vpop.f32.mrb[10].mxu1 }
 0x548   :  { %v1497_v14 = vmul.f32 0.001953125, %v1492_v35  ;;  %v2161_v3 = vpop.f32.mrb[11].mxu1 }
 0x54a   :  { %v1499_v4 = vsub.f32 %v1497_v14, %v1498_v2 }
 0x54c   :  { %v1500_v40 = vadd.f32 1e-05, %v1499_v4 }
 0x54e   :  { %2341 = vrsqrt.f32 %v1500_v40 }
 0x558   :  { %v2342_v7 = vpop.eup %2341 }
 0x559   :  { %v1502_v6 = vmul.f32 %v2342_v7, %v1332_v5 }
 0x55b   :  { %2165 = vmatmul.mubr.msk.f32.vlgmr.msra.gmra.mrb[12].mxu1 %vm631_vm9, %v1502_v6  ;;  %v1503_v11 = vmul.f32 %v1502_v6, %v1496_v1 }
 0x55c   :  { %2168 = vmatpush3.msra.mxu1 %v2740_v12  ;;  %2169 = vmatprep.mubr.msk.f32.mxu1 %vm2395_vm8, %v2396_v39 }
 0x55d   :  { %v1504_v13 = vsub.f32 %v1333_v36, %v1503_v11 }
 0x55f   :  { %2170 = vmatmul.mubr.msk.f32.vlgmr.msra.gmra.mrb[14].mxu1 %vm631_vm9, %v1504_v13 }
 0x62e   :  { %v1574_v16 = vpop.f32.mrb[12].mxu1 }
 0x62f   :  { %v1654_v20 = vrot.slane %v1574_v16, %v2768_v0  ;;  %v2166_v8 = vpop.f32.mrb[13].mxu1 }
 0x631   :  { %v1655_v61 = vmul.f32 %v1654_v20, %v2845_v31  ;;  %v1656_v21 = vmul.f32 %v1654_v20, %v2849_v34  ;;  %v1657_v22 = vmul.f32 %v2843_v30, %v1654_v20  ;;  %v1658_v18 = vmul.f32 %v2847_v33, %v1654_v20 }
 0x632   :  { %v1647_v24 = vpop.f32.mrb[14].mxu1 }
 0x633   :  { %v1662_v12 = vrot.slane %v1647_v24, %v2768_v0  ;;  %v2171_v49 = vpop.f32.mrb[15].mxu1 }
 0x635   :  { %v1663_v39 = vadd.f32 %v1662_v12, %v1655_v61  ;;  %v1664_v25 = vadd.f32 %v1662_v12, %v1656_v21  ;;  %v1665_v27 = vadd.f32 %v1662_v12, %v1657_v22  ;;  %v1666_v9 = vadd.f32 %v1662_v12, %v1658_v18 }
 0x637   :  { %v1667_v53 = vmax.f32 %v1663_v39, 0.0  ;;  %v1668_v46 = vmax.f32 %v1664_v25, 0.0  ;;  %v1669_v28 = vmax.f32 %v1665_v27, 0.0  ;;  %v1670_v10 = vmax.f32 %v1666_v9, 0.0 }
 0x639   :  { %1671 = vst [vmem:[#allocation6] sm:$0xff] %v1667_v53  ;;  %1672 = vst [vmem:[#allocation6 + $0x8] sm:$0xff] %v1668_v46 }
 0x63a   :  { %1673 = vst [vmem:[#allocation6 + $0x10] sm:$0xff] %v1669_v28  ;;  %1674 = vst [vmem:[#allocation6 + $0x18] sm:$0xff] %v1670_v10 }
 0x63b   :  { %2376 = shalt.err (!%p2373_p12)
}
 0x63c   :  { %s2377_s18 = scalar_lea.hbm %s2923_s9, 512 }
 0x63d   :  { %p2378_p13 = scmp.ne.s32.totalorder %s2923_s9, %s2377_s18  ;;  %p2381_p0 = scmp.lt.u32.totalorder %s2377_s18, %s2923_s9 }
 0x63f   :  { %p2383_p1 = pnand %p2381_p0, %p2378_p13 }
 0x641   :  { %2386 = shalt.err (!%p2383_p1)
}
 0x642   :  { %s2398_s22 = smov 128   ;;  %s2399_s23 = smov 8  }
 0x643   :  { %1686 = dma.vmem_to_hbm [thread:$0]  %s1681_s6, 512, %s2923_s9, [#allocation5], %s2398_s22, %s2398_s22, %s2399_s23  }
 0x644   :  { %2389 = dma.done.wait [#allocation5], 512  }
 0x645   :  { %2390 = vsyncadd [#allocation5], 4294966784 }
 0x646   :  { %1690 = vsyncpa [#allocation4], 1 }
 0x647   :  { %1691 = vsyncpa [#allocation5], 1 }

</bundles_post_ra>
